<compile_context>
chip_gen: v7x
topology: tpu7x:2x2x1
jax: 0.10.0
libtpu: 0.0.40
codegen_flags: <defaults>
</compile_context>

<pallas_src>
import functools

import jax
import jax.numpy as jnp
from jax.experimental import pallas as pl
from jax.experimental.pallas import tpu as pltpu


def _label_smooth_kernel(logits_ref, label_ref, loss_ref, *,
                         lb_pos, lb_neg, ignore_index, spatial_len, tl,
                         tiles_per_split):
    s = pl.program_id(1)          # spatial split (parallel; v7x 2-TC balance)
    t = pl.program_id(2)          # spatial tile inside split (arbitrary, accumulated)

    @pl.when(t == 0)
    def _init():
        loss_ref[...] = jnp.zeros_like(loss_ref)

    x = logits_ref[0]                                   # (C, TL) native dtype (no f32 copy)
    lbl = label_ref[0]                                  # (1, TL) int32
    num_classes = x.shape[0]

    # Numerically-stable log-softmax pieces via class-axis reductions.
    m = jnp.max(x, axis=0, keepdims=True).astype(jnp.float32)      # (1, TL)
    z = x - m                                                       # (C, TL) f32 (promoted in the sub)
    lse = jnp.log(jnp.sum(jnp.exp(z), axis=0, keepdims=True))       # (1, TL)

    # sum_c z_c = sum_c x_c - C*m  (reduce on the native block, f32 accumulate)
    sum_x = jnp.sum(x, axis=0, keepdims=True, dtype=jnp.float32)    # (1, TL)
    sum_z = sum_x - jnp.float32(num_classes) * m                    # (1, TL)

    # z[label] = x[label] - m via one masked reduce on the native block.
    class_idx = jax.lax.broadcasted_iota(jnp.int32, x.shape, 0)     # (C, TL)
    x_lab = jnp.sum(jnp.where(class_idx == lbl, x, 0),
                    axis=0, keepdims=True, dtype=jnp.float32)       # (1, TL)
    z_lab = x_lab - m

    # loss = -sum_c smooth_c * (z_c - lse)
    #      = (lb_pos + (C-1)*lb_neg)*lse - lb_neg*sum_z - (lb_pos-lb_neg)*z[label]
    coeff_lse = jnp.float32(lb_pos + (num_classes - 1) * lb_neg)
    loss = (coeff_lse * lse
            - jnp.float32(lb_neg) * sum_z
            - jnp.float32(lb_pos - lb_neg) * z_lab)                 # (1, TL)

    # Ragged spatial tail + ignore_index handled in-kernel (no HBM pad pass).
    block_l = s * tiles_per_split + t
    pos = jax.lax.broadcasted_iota(jnp.int32, lbl.shape, 1) + block_l * tl
    valid = (pos < spatial_len) & (lbl != ignore_index)             # (1, TL)

    loss_ref[...] += jnp.where(valid, loss,
                               jnp.float32(0.0)).reshape(loss_ref.shape)


def label_smooth_soft_loss(logits, label, *, lb_smooth=0.1, reduction="mean",
                           ignore_index=-100, max_spatial_tile=8192):
    """JAX/Pallas equivalent of LabelSmoothSoftLoss.forward.

    logits: (N, C, H, W) float (any float dtype; promoted to f32 in-register)
    label:  (N, H, W)    int   (may contain ignore_index)
    """
    N, C, H, W = logits.shape
    L = H * W
    x = logits.reshape(N, C, L)                        # free reshape, native dtype
    lbl = label.reshape(N, 1, L).astype(jnp.int32)

    itemsize = jnp.dtype(x.dtype).itemsize

    # Generation-aware VMEM budget (v7x has 64 MiB/TC vs 128 MiB on v5e/v6e).
    try:
        vmem_cap = getattr(pltpu.get_tpu_info(), "vmem_capacity_bytes", None)
    except Exception:
        vmem_cap = None
    if not vmem_cap:
        vmem_cap = 128 * 1024 * 1024
    budget = min(12 * 1024 * 1024, vmem_cap // 8)

    # Per-lane live bytes at steady state:
    #   2x double-buffered native (C, tl) input block : 2*C*itemsize
    #   ~3 f32 + 1 int32 (C, tl) in-kernel temps      : 4*C*4
    #   ~12 sublane-padded (8, tl) f32 row temps/acc  : 12*8*4
    bytes_per_lane = C * (2 * itemsize + 4 * 4) + 12 * 8 * 4
    tl = budget // bytes_per_lane
    tl = max(128, (tl // 128) * 128)
    tl = min(tl, max_spatial_tile)                     # cap (8, tl) row-temp padding
    tl = min(tl, pl.cdiv(L, 128) * 128)
    num_tiles = pl.cdiv(L, tl)

    # 2-way parallel spatial split so both v7x TensorCores get work even when
    # N == 1 (neutral on single-TC v5e/v6e).  Only when it divides evenly so
    # no block index ever goes fully out of range.
    num_splits = 2 if (num_tiles >= 2 and num_tiles % 2 == 0) else 1
    tiles_per_split = num_tiles // num_splits

    lb_pos = 1.0 - lb_smooth
    lb_neg = lb_smooth / C

    kernel = functools.partial(
        _label_smooth_kernel, lb_pos=lb_pos, lb_neg=lb_neg,
        ignore_index=ignore_index, spatial_len=L, tl=tl,
        tiles_per_split=tiles_per_split)

    cost = pl.CostEstimate(
        flops=10 * N * C * L,
        transcendentals=N * C * L + N * L,
        bytes_accessed=x.size * itemsize + lbl.size * 4
        + N * num_splits * tl * 4)

    loss_part = pl.pallas_call(
        kernel,
        out_shape=jax.ShapeDtypeStruct((N, num_splits, 1, tl), jnp.float32),
        grid_spec=pltpu.PrefetchScalarGridSpec(
            num_scalar_prefetch=0,
            grid=(N, num_splits, tiles_per_split),
            in_specs=[
                pl.BlockSpec((1, C, tl),
                             lambda n, s, t: (n, 0, s * tiles_per_split + t)),
                pl.BlockSpec((1, 1, tl),
                             lambda n, s, t: (n, 0, s * tiles_per_split + t)),
            ],
            out_specs=pl.BlockSpec((1, 1, 1, tl),
                                   lambda n, s, t: (n, s, 0, 0)),
        ),
        compiler_params=pltpu.CompilerParams(
            dimension_semantics=("parallel", "parallel", "arbitrary"),
            vmem_limit_bytes=32 * 1024 * 1024),
        cost_estimate=cost,
    )(x, lbl)

    loss_sum = jnp.sum(loss_part)
    # n_valid computed in the wrapper (N*L int read, negligible vs logits).
    n_valid = jnp.sum(label != ignore_index).astype(jnp.float32)

    if reduction == "mean":
        # Matches the PyTorch module exactly: plain division by n_valid
        # (an all-ignore batch yields NaN, as in PyTorch).
        return loss_sum / n_valid
    if reduction == "sum":
        return loss_sum
    # TODO(synk): reduction='none' would need a per-pixel (N,H,W) output;
    # only 'mean'/'sum' are implemented (module default is 'mean').
    raise NotImplementedError(reduction)


def _reference(logits, label, lb_smooth=0.1, ignore_index=-100):
    # pure-JAX reference mirroring the PyTorch module, for sanity checking
    N, C, H, W = logits.shape
    logits = logits.astype(jnp.float32)
    ignore = label == ignore_index
    n_valid = jnp.sum(~ignore)
    lbl = jnp.where(ignore, 0, label)
    lb_pos, lb_neg = 1.0 - lb_smooth, lb_smooth / C
    onehot = jax.nn.one_hot(lbl, C, axis=1, dtype=jnp.float32)      # (N,C,H,W)
    smooth = jnp.where(onehot > 0, lb_pos, lb_neg)
    logs = jax.nn.log_softmax(logits, axis=1)
    loss = -jnp.sum(logs * smooth, axis=1)                          # (N,H,W)
    loss = jnp.where(ignore, 0.0, loss)
    return jnp.sum(loss) / n_valid


if __name__ == "__main__":
    key = jax.random.PRNGKey(0)

    def run_case(N, C, H, W, case_key, **kwargs):
        k1, k2, k3 = jax.random.split(case_key, 3)
        logits = jax.random.normal(k1, (N, C, H, W), dtype=jnp.float32)
        label = jax.random.randint(k2, (N, H, W), 0, C, dtype=jnp.int32)
        drop = jax.random.bernoulli(k3, 0.1, (N, H, W))
        label = jnp.where(drop, jnp.int32(-100), label)
        got = jax.block_until_ready(
            label_smooth_soft_loss(logits, label, lb_smooth=0.1,
                                   reduction="mean", ignore_index=-100,
                                   **kwargs))
        want = _reference(logits, label)
        assert jnp.allclose(got, want, rtol=1e-5, atol=1e-4), \
            ((N, C, H, W), got, want)

    keys = jax.random.split(key, 3)
    # Module-spec shapes.
    run_case(2, 4, 16, 16, keys[0])
    # Ragged spatial extent (L % 128 != 0) exercises the in-kernel tail mask.
    run_case(1, 19, 9, 13, keys[1])
    # Multi-tile + 2-way parallel spatial split + ragged last tile + N == 1.
    run_case(1, 6, 20, 25, keys[2], max_spatial_tile=128)

    print("KERNEL_OK")
</pallas_src>

<mosaic_0001>
module attributes {stable_mosaic.version = 11 : i64} {
  func.func @_label_smooth_kernel(%arg0: i32, %arg1: i32, %arg2: i32, %arg3: memref<1x4x256xf32, #tpu.memory_space<vmem>>, %arg4: memref<1x1x256xi32, #tpu.memory_space<vmem>>, %arg5: memref<1x1x1x256xf32, #tpu.memory_space<vmem>>) attributes {dimension_semantics = [#tpu.dimension_semantics<parallel>, #tpu.dimension_semantics<parallel>, #tpu.dimension_semantics<arbitrary>], iteration_bounds = array<i64: 2, 1, 1>, scalar_prefetch = 0 : i64, scratch_operands = 0 : i64, tpu.core_type = #tpu.core_type<tc>, window_params = [{transform_indices = @transform_0, window_bounds = array<i64: 1, 4, 256>}, {transform_indices = @transform_1, window_bounds = array<i64: 1, 1, 256>}, {transform_indices = @transform_2, window_bounds = array<i64: 1, 1, 1, 256>}]} {
    %c0_i32 = arith.constant 0 : i32
    %0 = arith.cmpi eq, %arg2, %c0_i32 : i32
    %1 = arith.extui %0 : i1 to i32
    %c0_i32_0 = arith.constant 0 : i32
    %2 = arith.cmpi ne, %1, %c0_i32_0 : i32
    scf.if %2 {
      %cst_24 = arith.constant 0.000000e+00 : f32
      %54 = vector.broadcast %cst_24 : f32 to vector<1x1x1x256xf32>
      %c0_25 = arith.constant 0 : index
      %c0_26 = arith.constant 0 : index
      %c0_27 = arith.constant 0 : index
      %c0_28 = arith.constant 0 : index
      %55 = vector.load %arg5[%c0_25, %c0_26, %c0_27, %c0_28] : memref<1x1x1x256xf32, #tpu.memory_space<vmem>>, vector<1x1x1x256xf32>
      tpu.vector_store %arg5[%c0_25, %c0_26, %c0_27, %c0_28], %54 {strides = array<i32>} : memref<1x1x1x256xf32, #tpu.memory_space<vmem>>, vector<1x1x1x256xf32>,
    } else {
    }
    %c0 = arith.constant 0 : index
    %c0_1 = arith.constant 0 : index
    %c0_2 = arith.constant 0 : index
    %3 = vector.load %arg3[%c0, %c0_1, %c0_2] : memref<1x4x256xf32, #tpu.memory_space<vmem>>, vector<1x4x256xf32>
    %4 = vector.shape_cast %3 : vector<1x4x256xf32> to vector<4x256xf32>
    %c0_3 = arith.constant 0 : index
    %c0_4 = arith.constant 0 : index
    %c0_5 = arith.constant 0 : index
    %5 = vector.load %arg4[%c0_3, %c0_4, %c0_5] : memref<1x1x256xi32, #tpu.memory_space<vmem>>, vector<1x1x256xi32>
    %6 = vector.shape_cast %5 : vector<1x1x256xi32> to vector<1x256xi32>
    %cst = arith.constant dense<0xFF800000> : vector<256xf32>
    %7 = vector.multi_reduction <maximumf>, %4, %cst [0] : vector<4x256xf32> to vector<256xf32>
    %8 = vector.shape_cast %7 : vector<256xf32> to vector<1x256xf32>
    %9 = vector.broadcast %8 : vector<1x256xf32> to vector<4x256xf32>
    %10 = arith.subf %4, %9 : vector<4x256xf32>
    %11 = math.exp %10 : vector<4x256xf32>
    %cst_6 = arith.constant dense<0.000000e+00> : vector<256xf32>
    %12 = vector.multi_reduction <add>, %11, %cst_6 [0] : vector<4x256xf32> to vector<256xf32>
    %13 = vector.shape_cast %12 : vector<256xf32> to vector<1x256xf32>
    %14 = math.log %13 : vector<1x256xf32>
    %cst_7 = arith.constant dense<0.000000e+00> : vector<256xf32>
    %15 = vector.multi_reduction <add>, %4, %cst_7 [0] : vector<4x256xf32> to vector<256xf32>
    %16 = vector.shape_cast %15 : vector<256xf32> to vector<1x256xf32>
    %cst_8 = arith.constant 4.000000e+00 : f32
    %17 = vector.broadcast %cst_8 : f32 to vector<1x256xf32>
    %18 = arith.mulf %17, %8 : vector<1x256xf32>
    %19 = arith.subf %16, %18 : vector<1x256xf32>
    %20 = tpu.iota {dimensions = array<i32: 0>} : vector<4x256xi32>
    %21 = vector.broadcast %6 : vector<1x256xi32> to vector<4x256xi32>
    %22 = arith.cmpi eq, %20, %21 : vector<4x256xi32>
    %c0_i32_9 = arith.constant 0 : i32
    %23 = arith.sitofp %c0_i32_9 : i32 to f32
    %24 = vector.broadcast %23 : f32 to vector<4x256xf32>
    %25 = arith.select %22, %4, %24 : vector<4x256xi1>, vector<4x256xf32>
    %cst_10 = arith.constant dense<0.000000e+00> : vector<256xf32>
    %26 = vector.multi_reduction <add>, %25, %cst_10 [0] : vector<4x256xf32> to vector<256xf32>
    %27 = vector.shape_cast %26 : vector<256xf32> to vector<1x256xf32>
    %28 = arith.subf %27, %8 : vector<1x256xf32>
    %cst_11 = arith.constant 9.750000e-01 : f32
    %29 = vector.broadcast %cst_11 : f32 to vector<1x256xf32>
    %30 = arith.mulf %29, %14 : vector<1x256xf32>
    %cst_12 = arith.constant 2.500000e-02 : f32
    %31 = vector.broadcast %cst_12 : f32 to vector<1x256xf32>
    %32 = arith.mulf %31, %19 : vector<1x256xf32>
    %33 = arith.subf %30, %32 : vector<1x256xf32>
    %cst_13 = arith.constant 8.750000e-01 : f32
    %34 = vector.broadcast %cst_13 : f32 to vector<1x256xf32>
    %35 = arith.mulf %34, %28 : vector<1x256xf32>
    %36 = arith.subf %33, %35 : vector<1x256xf32>
    %c1_i32 = arith.constant 1 : i32
    %37 = arith.muli %arg1, %c1_i32 : i32
    %38 = arith.addi %37, %arg2 : i32
    %39 = tpu.iota {dimensions = array<i32: 1>} : vector<1x256xi32>
    %c256_i32 = arith.constant 256 : i32
    %40 = arith.muli %38, %c256_i32 : i32
    %41 = vector.broadcast %40 : i32 to vector<1x256xi32>
    %42 = arith.addi %39, %41 : vector<1x256xi32>
    %c256_i32_14 = arith.constant 256 : i32
    %43 = vector.broadcast %c256_i32_14 : i32 to vector<1x256xi32>
    %44 = arith.cmpi slt, %42, %43 : vector<1x256xi32>
    %c-100_i32 = arith.constant -100 : i32
    %45 = vector.broadcast %c-100_i32 : i32 to vector<1x256xi32>
    %46 = arith.cmpi ne, %6, %45 : vector<1x256xi32>
    %47 = arith.andi %44, %46 : vector<1x256xi1>
    %c0_15 = arith.constant 0 : index
    %c0_16 = arith.constant 0 : index
    %c0_17 = arith.constant 0 : index
    %c0_18 = arith.constant 0 : index
    %48 = vector.load %arg5[%c0_15, %c0_16, %c0_17, %c0_18] : memref<1x1x1x256xf32, #tpu.memory_space<vmem>>, vector<1x1x1x256xf32>
    %cst_19 = arith.constant 0.000000e+00 : f32
    %49 = vector.broadcast %cst_19 : f32 to vector<1x256xf32>
    %50 = arith.select %47, %36, %49 : vector<1x256xi1>, vector<1x256xf32>
    %51 = vector.shape_cast %50 : vector<1x256xf32> to vector<1x1x1x256xf32>
    %52 = arith.addf %48, %51 : vector<1x1x1x256xf32>
    %c0_20 = arith.constant 0 : index
    %c0_21 = arith.constant 0 : index
    %c0_22 = arith.constant 0 : index
    %c0_23 = arith.constant 0 : index
    %53 = vector.load %arg5[%c0_20, %c0_21, %c0_22, %c0_23] : memref<1x1x1x256xf32, #tpu.memory_space<vmem>>, vector<1x1x1x256xf32>
    tpu.vector_store %arg5[%c0_20, %c0_21, %c0_22, %c0_23], %52 {strides = array<i32>} : memref<1x1x1x256xf32, #tpu.memory_space<vmem>>, vector<1x1x1x256xf32>,
    return
  }
  func.func @transform_0(%arg0: i32, %arg1: i32, %arg2: i32) -> (i32, i32, i32) {
    %c1_i32 = arith.constant 1 : i32
    %0 = arith.muli %arg1, %c1_i32 : i32
    %1 = arith.addi %0, %arg2 : i32
    %c0_i32 = arith.constant 0 : i32
    %c0_i32_0 = arith.constant 0 : i32
    return %arg0, %c0_i32, %1 : i32, i32, i32
  }
  func.func @transform_1(%arg0: i32, %arg1: i32, %arg2: i32) -> (i32, i32, i32) {
    %c1_i32 = arith.constant 1 : i32
    %0 = arith.muli %arg1, %c1_i32 : i32
    %1 = arith.addi %0, %arg2 : i32
    %c0_i32 = arith.constant 0 : i32
    %c0_i32_0 = arith.constant 0 : i32
    return %arg0, %c0_i32, %1 : i32, i32, i32
  }
  func.func @transform_2(%arg0: i32, %arg1: i32, %arg2: i32) -> (i32, i32, i32, i32) {
    %c0_i32 = arith.constant 0 : i32
    %c0_i32_0 = arith.constant 0 : i32
    %c0_i32_1 = arith.constant 0 : i32
    return %arg0, %arg1, %c0_i32, %c0_i32_0 : i32, i32, i32, i32
  }
}

</mosaic_0001>

<bundles_post_ra>
// kernel: tpu_custom_call.1
= control target key start
LH: loop header
LB: loop body
LE: loop exit
PB: predicated region body
PF: predicated region fallthrough
CT: control target
= control target key end

     0   :  { %7 = vsyncpa [#allocation3], 0  ;;  %s1070_s0 = inlined_call_operand.hbm [shape: f32[2,4,256], index: 0, kind: input, shape index: {}]   ;;  %s1071_s1 = inlined_call_operand.hbm [shape: s32[2,1,256], index: 1, kind: input, shape index: {}]   ;;  %s1072_s2 = inlined_call_operand.hbm [shape: f32[2,1,1,256], index: 2, kind: output, shape index: {}]  }
   0x1   :  { %9 = vsyncpa [#allocation3 + $0x1], 0 }
   0x2   :  { %10 = vsyncpa [#allocation6], 0 }
   0x3   :  { %12 = vsyncpa [#allocation6 + $0x1], 0 }
   0x4   :  { %13 = vsyncpa [#allocation4], 0 }
   0x5   :  { %15 = vsyncpa [#allocation4 + $0x1], 0  ;;  %s803_s9 = smov 0   ;;  %s805_s10 = smov 0  }
   0x6   :  { %s807_s11 = smov 0   ;;  %s809_s12 = smov 0  }
   0x7   :  { %s811_s13 = smov 0   ;;  %s813_s14 = smov 0  }
   0x8 LB: > { %s535_s15 = sadd.s32 4294967295, %s780_s14   ;;  %s536_s16 = sadd.s32 4294967294, %s780_s14   ;;  %s780_s14 = sphi %s813_s14, %s21_s14   ;;  %s776_s13 = sphi %s811_s13, %s1094_s13   ;;  %s772_s12 = sphi %s809_s12, %s1093_s12   ;;  %s768_s11 = sphi %s807_s11, %s1092_s11   ;;  %s764_s10 = sphi %s805_s10, %s1091_s10   ;;  %s760_s9 = sphi %s803_s9, %s1090_s9  }
   0x9   : > { %s40_s17 = sadd.s32 1, %s776_s13  ;;  %s51_s18 = sadd.s32 1, %s768_s11 }
   0xa   : > { %p42_p0 = scmp.ge.s32.totalorder %s40_s17, 2  ;;  %p58_p1 = scmp.ne.s32.totalorder %s768_s11, %s764_s10 }
   0xb   : > { %p59_p2 = scmp.eq.s32.totalorder %s780_s14, 0  ;;  %p64_p3 = scmp.ne.s32.totalorder %s764_s10, %s760_s9 }
   0xc   : > { %s1096_s17 = smov (%p42_p0, %s40_s17), 0  ;;  %p65_p5 = scmp.eq.s32.totalorder %s535_s15, 0 }
   0xd   : > { %p844_p4 = por %p59_p2, %p58_p1  ;;  %s46_s20 = ssub.s32 %s776_s13, %s1096_s17 }
   0xe   : > { %p120_p6 = scmp.eq.s32.totalorder %s535_s15, 1  ;;  %p49_p7 = scmp.eq.s32.totalorder %s46_s20, 0 }
   0xf   : > { %p850_p8 = por %p65_p5, %p64_p3  ;;  %p126_p10 = scmp.eq.s32.totalorder %s536_s16, 1 }
  0x10   : > { %p854_p9 = por %p120_p6, %p58_p1  ;;  %p574_p13 = scmp.lt.s32.totalorder %s780_s14, 2 }
  0x11   : > { %s1076_s21 = scalar_select %p850_p8, 1, 0 }
  0x12   : > { %s1077_s22 = scalar_select %p854_p9, 1, 0 }
  0x13   : > { %s859_s23 = scalar_select %p49_p7, %s768_s11, %s51_s18  }
  0x14   : > { %p861_p11 = por %p126_p10, %p64_p3  ;;  %s868_s25 = sand.u32 1, %s768_s11  }
  0x15   : > { %s539_s26 = sshll.u32 %s868_s25, 3  ;;  %s554_s27 = sshll.u32 %s776_s13, 7 }
  0x16   : > { %s1078_s24 = scalar_select %p861_p11, 1, 0 }
  0x17   : > { %s875_s30 = scalar_lea.hbm %s1070_s0, %s554_s27  ;;  %s150_s3 = scalar_lea.vmem [#allocation2], %s539_s26 }
  0x18   : > { %s161_s4 = sshll.u32 %s150_s3, 4  ;;  %p881_p0 = pnand %p574_p13, %p844_p4  ;;  %s877_s4 = int_to_ptr.vmem [resolvable:$true] %s161_s4 }
  0x19   : > { %s147_s6 = scalar_lea.sflag [#allocation3], %s868_s25  ;;  %s634_s7 = scalar_lea.hbm %s875_s30, 128 }
  0x1a   : > { %p635_p3 = scmp.ne.s32.totalorder %s875_s30, %s634_s7  ;;  %p636_p5 = pneg %p881_p0 }
  0x1b   : > { %s639_s16 = scalar_lea.hbm %s1070_s0, 256  ;;  %p640_p4 = scmp.lt.u32.totalorder %s875_s30, %s1070_s0 }
  0x1c   : > { %p637_p6 = pnand %p636_p5, %p635_p3  ;;  %p641_p10 = scmp.lt.u32.totalorder %s639_s16, %s634_s7 }
  0x1d   : > { %p643_p12 = scmp.lt.u32.totalorder %s634_s7, %s875_s30 }
  0x1e   : > { %p638_p7 = pneg %p637_p6  ;;  %p642_p13 = por %p641_p10, %p640_p4 }
  0x20   : > { %p644_p1 = por %p643_p12, %p642_p13 }
  0x22   : > { %p645_p2 = pnand %p644_p1, %p638_p7 }
  0x24   : > { %648 = shalt.err (!%p645_p2)
}
  0x25   : > { %s649_s20 = scalar_lea.vmem %s877_s4, 128  ;;  %s782_s26 = smov [#allocation2]  }
  0x26   : > { %p650_p3 = scmp.ne.s32.totalorder %s877_s4, %s649_s20  ;;  %s654_s27 = sshll.u32 %s782_s26, 4  ;;  %s655_s27 = int_to_ptr.vmem [resolvable:$false] %s654_s27 }
  0x27   : > { %s656_s28 = scalar_lea.vmem %s655_s27, 256  ;;  %p657_p9 = scmp.lt.s32.totalorder %s877_s4, %s655_s27 }
  0x28   : > { %p652_p6 = pnand %p650_p3, %p636_p5  ;;  %p658_p4 = scmp.lt.s32.totalorder %s656_s28, %s649_s20 }
  0x2a   : > { %p653_p11 = pneg %p652_p6  ;;  %p659_p10 = por %p658_p4, %p657_p9 }
  0x2c   : > { %p660_p12 = pnand %p659_p10, %p653_p11 }
  0x2e   : > { %663 = shalt.err (!%p660_p12)
}
  0x2f   : > { %566 = dma.hbm_to_vmem [thread:$0]  (!%p881_p0), %s875_s30, 128, %s877_s4, %s147_s6  }
  0x30   : > { %p1080_p1 = scmp.lt.s32.totalorder %s780_s14, 3  ;;  %p1081_p2 = scmp.ge.s32.totalorder %s780_s14, 1 }
  0x31   : > { %s542_s3 = sshll.u32 %s868_s25, 1  ;;  %s555_s7 = sshll.u32 %s776_s13, 5 }
  0x32   : > { %p917_p7 = pnand %p1081_p2, %p1080_p1  ;;  %s926_s16 = scalar_lea.hbm %s1071_s1, %s555_s7 }
  0x33   : > { %s172_s18 = scalar_lea.vmem [#allocation5], %s542_s3  ;;  %s169_s30 = scalar_lea.sflag [#allocation6], %s868_s25 }
  0x34   : > { %s1082_s29 = scalar_select %p917_p7, 1, 0 }
  0x35   : > { %s183_s19 = sshll.u32 %s172_s18, 4  ;;  %s664_s4 = scalar_lea.hbm %s926_s16, 32  ;;  %s184_s19 = int_to_ptr.vmem [resolvable:$true] %s183_s19 }
  0x36   : > { %p665_p9 = scmp.ne.s32.totalorder %s926_s16, %s664_s4  ;;  %s669_s26 = scalar_lea.hbm %s1071_s1, 64 }
  0x37   : > { %p670_p3 = scmp.lt.u32.totalorder %s926_s16, %s1071_s1  ;;  %p671_p6 = scmp.lt.u32.totalorder %s669_s26, %s664_s4 }
  0x38   : > { %p667_p11 = pnand %p665_p9, %p636_p5  ;;  %p673_p10 = scmp.lt.u32.totalorder %s664_s4, %s926_s16 }
  0x39   : > { %p672_p4 = por %p671_p6, %p670_p3 }
  0x3a   : > { %p668_p13 = pneg %p667_p11 }
  0x3b   : > { %p674_p12 = por %p673_p10, %p672_p4 }
  0x3d   : > { %p675_p1 = pnand %p674_p12, %p668_p13 }
  0x3f   : > { %678 = shalt.err (!%p675_p1)
}
  0x40   : > { %s679_s25 = scalar_lea.vmem %s184_s19, 32  ;;  %s783_s3 = smov [#allocation5]  }
  0x41   : > { %p680_p2 = scmp.ne.s32.totalorder %s184_s19, %s679_s25  ;;  %s684_s7 = sshll.u32 %s783_s3, 4  ;;  %s685_s7 = int_to_ptr.vmem [resolvable:$false] %s684_s7 }
  0x42   : > { %s686_s8 = scalar_lea.vmem %s685_s7, 64  ;;  %p687_p8 = scmp.lt.s32.totalorder %s184_s19, %s685_s7 }
  0x43   : > { %p682_p9 = pnand %p680_p2, %p636_p5  ;;  %p688_p7 = scmp.lt.s32.totalorder %s686_s8, %s679_s25 }
  0x45   : > { %p683_p11 = pneg %p682_p9  ;;  %p689_p3 = por %p688_p7, %p687_p8 }
  0x47   : > { %p690_p6 = pnand %p689_p3, %p683_p11 }
  0x49   : > { %693 = shalt.err (!%p690_p6)
}
  0x4a   : > { %569 = dma.hbm_to_vmem [thread:$0]  (!%p881_p0), %s926_s16, 32, %s184_s19, %s169_s30  }
  0x4b   : > { %p1083_p13 = scmp.ne.s32.totalorder %s1082_s29, 0 }
  0x4c   : > { %s951_s15 = sand.u32 (!%p1083_p13), 1, %s764_s10   ;;  %p1084_p5 = scmp.ne.s32.totalorder (!%p1083_p13), %s1076_s21, 0 }
  0x4d   : > { %192 = sbr.rel (%p1083_p13) target bundleno = 178 (0xb2), region = 28  ;;  %s546_s18 = sshll.u32 (!%p1083_p13), %s951_s15, 3 }
  0x4e   : > { %s195_s4 = scalar_lea.sflag (!%p1083_p13), [#allocation3], %s951_s15  ;;  %s198_s6 = scalar_lea.vmem (!%p1083_p13), [#allocation2], %s546_s18 }
  0x54   : > { %747 = dma.done.wait (%p1084_p5), %s195_s4, 128  }
  0x55   : > { %749 = vsyncadd (%p1084_p5), %s195_s4, 4294967168  ;;  %s547_s5 = sshll.u32 %s951_s15, 1  ;;  %s204_s29 = scalar_lea.sflag [#allocation6], %s951_s15 }
  0x56   : > { %s207_s16 = scalar_lea.vmem [#allocation5], %s547_s5 }
  0x57   : > { %751 = dma.done.wait (%p1084_p5), %s204_s29, 32  }
  0x58   : > { %753 = vsyncadd (%p1084_p5), %s204_s29, 4294967264  ;;  %v241_v0 = vlaneseq  ;;  %s969_s19 = scalar_lea.vmem [#allocation7], %s547_s5  ;;  %v784_v2 = vmov 0.0   ;;  %vm251_vm1 = vcmask 1043456   ;;  %v246_v3 = vld [vmem:[%s198_s6] sm:$0xff]  ;;  %s556_s21 = sshll.u32 %s772_s12, 5 }
  0x59   : > { %v249_v4 = vcombine.high %v246_v3, %v246_v3  ;;  %v252_v5 = vsel %vm251_vm1, %v246_v3, -inf  ;;  %v983_v21 = vld [vmem:[%s207_s16] sm:$0x3]  ;;  %v294_v29 = vsel %vm251_vm1, %v246_v3, 0.0  ;;  %s420_s30 = sshll.u32 %s969_s19, 4  ;;  %s1018_s27 = scalar_lea.hbm %s1072_s2, %s556_s21  ;;  %s1020_s30 = int_to_ptr.vmem [resolvable:$true] %s420_s30 }
  0x5a   : > { %vm965_vm0 = vcmp.lt.s32.totalorder %v241_v0, 256  ;;  %v253_v6 = vrot.slane %v252_v5, 4  ;;  %v976_v16 = vshrl.u32 %v241_v0, 7  ;;  %v295_v33 = vrot.slane %v294_v29, 4  ;;  %s404_s28 = scalar_lea.sflag [#allocation4], %s951_s15  ;;  %s694_s25 = scalar_lea.vmem %s1020_s30, 32 }
  0x5b   : > { %245 = vst.msk [vmem:[%s969_s19] sm:$0x3] %vm965_vm0, %v784_v2  ;;  %v259_v7 = vsel %vm251_vm1, %v249_v4, -inf  ;;  %v301_v30 = vsel %vm251_vm1, %v249_v4, 0.0  ;;  %vm362_vm4 = vcmp.ne.s32.totalorder %v983_v21, 4294967196  ;;  %p695_p8 = scmp.ne.s32.totalorder %s1020_s30, %s694_s25  ;;  %p1087_p0 = scmp.ne.s32.totalorder %s1077_s22, 0 }
  0x5c   : > { %v254_v8 = vmax.f32 %v252_v5, %v253_v6  ;;  %v260_v9 = vrot.slane %v259_v7, 4  ;;  %v316_v20 = vsub.s32 0, %v976_v16  ;;  %v320_v23 = vsub.s32 1, %v976_v16  ;;  %s787_s12 = smov [#allocation7]  }
  0x5d   : > { %v302_v34 = vrot.slane %v301_v30, 4  ;;  %v296_v40 = vadd.f32 %v295_v33, %v294_v29  ;;  %p696_p7 = pnand %p695_p8, %p1087_p0  ;;  %s698_s3 = sshll.u32 %s787_s12, 4  ;;  %s699_s3 = int_to_ptr.vmem [resolvable:$false] %s698_s3 }
  0x5e   : > { %v255_v10 = vrot.slane %v254_v8, 2  ;;  %v261_v11 = vmax.f32 %v259_v7, %v260_v9  ;;  %v317_v25 = vrot.slane %v983_v21, %v316_v20  ;;  %v321_v27 = vrot.slane %v983_v21, %v320_v23  ;;  %s700_s7 = scalar_lea.vmem %s699_s3, 64  ;;  %p701_p10 = scmp.lt.s32.totalorder %s1020_s30, %s699_s3 }
  0x5f   : > { %v303_v43 = vadd.f32 %v302_v34, %v301_v30  ;;  %v297_v48 = vrot.slane %v296_v40, 2  ;;  %p697_p4 = pneg %p696_p7  ;;  %p702_p12 = scmp.lt.s32.totalorder %s700_s7, %s694_s25 }
  0x60   : > { %v256_v12 = vmax.f32 %v254_v8, %v255_v10  ;;  %v262_v13 = vrot.slane %v261_v11, 2  ;;  %vm322_vm2 = vcmp.eq.s32.totalorder %v976_v16, %v317_v25  ;;  %vm323_vm3 = vcmp.eq.s32.totalorder %v976_v16, %v321_v27 }
  0x61   : > { %v324_v28 = vsel %vm322_vm2, %v246_v3, 0.0  ;;  %v325_v31 = vsel %vm323_vm3, %v249_v4, 0.0  ;;  %v304_v52 = vrot.slane %v303_v43, 2  ;;  %v298_v56 = vadd.f32 %v297_v48, %v296_v40  ;;  %p703_p1 = por %p702_p12, %p701_p10 }
  0x62   : > { %v257_v14 = vrot.slane %v256_v12, 1  ;;  %v263_v15 = vmax.f32 %v261_v11, %v262_v13  ;;  %v326_v32 = vsel %vm251_vm1, %v324_v28, 0.0  ;;  %v333_v35 = vsel %vm251_vm1, %v325_v31, 0.0 }
  0x63   : > { %v327_v36 = vrot.slane %v326_v32, 4  ;;  %v334_v41 = vrot.slane %v333_v35, 4  ;;  %v305_v60 = vadd.f32 %v304_v52, %v303_v43  ;;  %v299_v0 = vrot.slane %v298_v56, 1  ;;  %p704_p2 = pnand %p703_p1, %p697_p4 }
  0x64   : > { %v978_v17 = vmax.f32 %v256_v12, %v257_v14  ;;  %v264_v18 = vrot.slane %v263_v15, 1  ;;  %v786_v31 = vmov 1966171168  }
  0x65   : > { %v328_v45 = vadd.f32 %v327_v36, %v326_v32  ;;  %v335_v49 = vadd.f32 %v334_v41, %v333_v35  ;;  %v306_v4 = vrot.slane %v305_v60, 1  ;;  %v300_v6 = vadd.f32 %v299_v0, %v298_v56 }
  0x66   : > { %v980_v19 = vmax.f32 %v263_v15, %v264_v18  ;;  %v308_v7 = vmul.f32 4.0, %v978_v17  ;;  %v785_v18 = vmov 0   ;;  %v383_v32 = vunpack.c.l.s4 %v786_v31 }
  0x67   : > { %v329_v53 = vrot.slane %v328_v45, 2  ;;  %v336_v57 = vrot.slane %v335_v49, 2  ;;  %v307_v9 = vadd.f32 %v306_v4, %v305_v60 }
  0x68   : > { %v268_v22 = vcombine.low %v978_v17, %v980_v19  ;;  %v309_v10 = vmul.f32 4.0, %v980_v19  ;;  %v310_v12 = vsub.f32 %v300_v6, %v308_v7 }
  0x69   : > { %v330_v61 = vadd.f32 %v329_v53, %v328_v45  ;;  %v337_v2 = vadd.f32 %v336_v57, %v335_v49 }
  0x6a   : > { %v270_v24 = vsub.f32 %v246_v3, %v268_v22  ;;  %v311_v14 = vsub.f32 %v307_v9, %v309_v10  ;;  %v363_v22 = vsel %vm362_vm4, 1, %v785_v18  ;;  %v344_v27 = vmul.f32 0.025, %v310_v12 }
  0x6b   : > { %v331_v5 = vrot.slane %v330_v61, 1  ;;  %v338_v8 = vrot.slane %v337_v2, 1  ;;  %v367_v30 = vrot.slane %v363_v22, %v316_v20 }
  0x6c   : > { %v271_v26 = vmul.f32 1.442695, %v270_v24  ;;  %v345_v29 = vmul.f32 0.025, %v311_v14 }
  0x6d   : > { %v332_v11 = vadd.f32 %v331_v5, %v330_v61  ;;  %v339_v13 = vadd.f32 %v338_v8, %v337_v2  ;;  %vm372_vm5 = vcmp.ne.s32.totalorder %v367_v30, 0 }
  0x6e   : > { %628 = vpow2.f32 %v271_v26 }
  0x6f   : > { %v340_v15 = vsub.f32 %v332_v11, %v978_v17  ;;  %v341_v26 = vsub.f32 %v339_v13, %v980_v19  ;;  %v371_v17 = vrot.slane %v363_v22, %v320_v23 }
  0x71   : > { %v348_v34 = vmul.f32 0.875, %v340_v15  ;;  %v349_v19 = vmul.f32 0.875, %v341_v26  ;;  %vm373_vm6 = vcmp.ne.s32.totalorder %v371_v17, 0 }
  0x78   : > { %v629_v37 = vpop.eup %628 }
  0x79   : > { %v274_v38 = vcombine.high %v629_v37, %v629_v37  ;;  %v276_v39 = vsel %vm251_vm1, %v629_v37, 0.0  ;;  %v384_v37 = vunpack.c.0.s8 %v383_v32 }
  0x7a   : > { %v277_v42 = vrot.slane %v276_v39, 4 }
  0x7b   : > { %v283_v44 = vsel %vm251_vm1, %v274_v38, 0.0  ;;  %v387_v41 = vsub.s32 %v384_v37, %v976_v16 }
  0x7c   : > { %v278_v46 = vadd.f32 %v277_v42, %v276_v39  ;;  %v284_v47 = vrot.slane %v283_v44, 4 }
  0x7e   : > { %v279_v50 = vrot.slane %v278_v46, 2  ;;  %v285_v51 = vadd.f32 %v284_v47, %v283_v44  ;;  %v376_v44 = vld [vmem:[%s969_s19] sm:$0x3] }
  0x80   : > { %v280_v54 = vadd.f32 %v279_v50, %v278_v46  ;;  %v286_v55 = vrot.slane %v285_v51, 2 }
  0x82   : > { %v281_v58 = vrot.slane %v280_v54, 1  ;;  %v287_v59 = vadd.f32 %v286_v55, %v285_v51 }
  0x84   : > { %v282_v62 = vadd.f32 %v281_v58, %v280_v54  ;;  %v288_v63 = vrot.slane %v287_v59, 1 }
  0x86   : > { %v289_v3 = vadd.f32 %v288_v63, %v287_v59  ;;  %630 = vlog2.f32 %v282_v62 }
  0x88   : > { %632 = vlog2.f32 %v289_v3 }
  0x90   : > { %v631_v24 = vpop.eup %630 }
  0x91   : > { %v291_v25 = vmul.f32 0.6931472, %v631_v24 }
  0x92   : > { %v633_v28 = vpop.eup %632 }
  0x93   : > { %v293_v21 = vmul.f32 0.6931472, %v633_v28  ;;  %v342_v33 = vmul.f32 0.975, %v291_v25 }
  0x95   : > { %v343_v35 = vmul.f32 0.975, %v293_v21  ;;  %v346_v36 = vsub.f32 %v342_v33, %v344_v27 }
  0x97   : > { %v347_v38 = vsub.f32 %v343_v35, %v345_v29  ;;  %v350_v39 = vsub.f32 %v346_v36, %v348_v34 }
  0x99   : > { %v351_v20 = vsub.f32 %v347_v38, %v349_v19  ;;  %v377_v40 = vsel %vm372_vm5, %v350_v39, 0.0 }
  0x9b   : > { %v378_v42 = vsel %vm373_vm6, %v351_v20, 0.0 }
  0x9c   : > { %v381_v43 = vcombine.low %v377_v40, %v378_v42 }
  0x9e   : > { %v388_v23 = vrot.slane %v381_v43, %v387_v41 }
  0xa0   : > { %v395_v45 = vrot.slane %v388_v23, %v387_v41 }
  0xa2   : > { %v397_v46 = vadd.f32 %v395_v45, %v376_v44 }
  0xa4   : > { %402 = vst.msk [vmem:[%s969_s19] sm:$0x3] %vm965_vm0, %v397_v46 }
  0xa5   : > { %707 = shalt.err (!%p704_p2)
}
  0xa6   : > { %s708_s8 = scalar_lea.hbm %s1018_s27, 32  ;;  %s712_s4 = scalar_lea.hbm %s1072_s2, 64 }
  0xa7   : > { %p709_p9 = scmp.ne.s32.totalorder %s1018_s27, %s708_s8  ;;  %p713_p6 = scmp.lt.u32.totalorder %s1018_s27, %s1072_s2 }
  0xa8   : > { %p714_p13 = scmp.lt.u32.totalorder %s712_s4, %s708_s8  ;;  %p716_p8 = scmp.lt.u32.totalorder %s708_s8, %s1018_s27 }
  0xa9   : > { %p710_p11 = pnand %p709_p9, %p1087_p0 }
  0xaa   : > { %p715_p5 = por %p714_p13, %p713_p6 }
  0xab   : > { %p711_p3 = pneg %p710_p11 }
  0xac   : > { %p717_p7 = por %p716_p8, %p715_p5 }
  0xae   : > { %p718_p4 = pnand %p717_p7, %p711_p3 }
  0xb0   : > { %721 = shalt.err (!%p718_p4)
}
  0xb1   : > { %561 = dma.vmem_to_hbm [thread:$0]  (%p1087_p0), %s1020_s30, 32, %s1018_s27, %s404_s28  }
  0xb2 PF: > { %s432_s29 = sand.u32 1, %s760_s9   ;;  %p1088_p10 = scmp.ne.s32.totalorder %s1078_s24, 0 }
  0xb3   : > { %p1089_p12 = scmp.ge.s32.totalorder %s780_s14, 2  ;;  %s433_s16 = scalar_lea.sflag [#allocation4], %s432_s29 }
  0xb5   : > { %p571_p1 = pnand %p1089_p12, %p1088_p10 }
  0xb7   : > { %755 = dma.done.wait (!%p571_p1), %s433_s16, 32  }
  0xb8   : > { %757 = vsyncadd (!%p571_p1), %s433_s16, 4294967264  ;;  %s21_s14 = sadd.s32 1, %s780_s14   ;;  %s1090_s9 = smov %s764_s10 }
  0xb9   : > { %p18_p2 = scmp.ge.s32.totalorder %s21_s14, 4   ;;  %s1091_s10 = smov %s768_s11 }
  0xba   : > { %s1092_s11 = smov %s859_s23  ;;  %s1093_s12 = smov %s776_s13 }
  0xbb   : > { %s1094_s13 = smov %s1096_s17  ;;  %20 = sbr.rel (!%p18_p2) target bundleno = 8 (0x8), region = 90 }
  0xc2   :  { %438 = vsyncpa [#allocation3], 1 }
  0xc3   :  { %440 = vsyncpa [#allocation3 + $0x1], 1 }
  0xc4   :  { %441 = vsyncpa [#allocation6], 1 }
  0xc5   :  { %443 = vsyncpa [#allocation6 + $0x1], 1 }
  0xc6   :  { %444 = vsyncpa [#allocation4], 1 }
  0xc7   :  { %446 = vsyncpa [#allocation4 + $0x1], 1 }

</bundles_post_ra>
